<compile_context>
chip_gen: v7x
topology: tpu7x:2x2x1
jax: 0.10.0
libtpu: 0.0.40
codegen_flags: <defaults>
</compile_context>

<pallas_src>
import functools

import jax
import jax.numpy as jnp
from jax.experimental import pallas as pl
from jax.experimental.pallas import tpu as pltpu

HIDDEN = 1024  # hardcoded in the PyTorch module


def _round_up(n, m):
    return ((n + m - 1) // m) * m


def _disc_kernel(x_ref, w1_ref, b1_ref, w2_ref, b2_ref, o_ref):
    # x_ref : (bb, D)      VMEM f32 (cast to bf16 for the MXU)
    # w1_ref: (D, 1024)    VMEM bf16 (resident, single-buffered)
    # b1_ref: (1, 1024)    VMEM f32
    # w2_ref: (1, 1024)    VMEM f32 (layer-2 weights as a row; used on the VPU/XLU)
    # b2_ref: (1, 1)       SMEM f32 scalar
    # o_ref : (bb, 1)      VMEM f32 sigmoid outputs for this batch tile
    x = x_ref[...].astype(jnp.bfloat16)

    # Layer 1 on the MXU (bf16 operands, f32 accumulation) + bias + ReLU fused in f32.
    h = jnp.dot(x, w1_ref[...], preferred_element_type=jnp.float32)
    h = jnp.maximum(h + b1_ref[...], 0.0)

    # Layer 2 on the VPU/XLU in f32: broadcast-multiply by the w2 row, reduce over HIDDEN.
    # Avoids MXU weight-tile passes / h re-layout and keeps the contraction full precision.
    logits = jnp.sum(h * w2_ref[...], axis=-1, keepdims=True)  # (bb, 1)

    o_ref[...] = jax.nn.sigmoid(logits + b2_ref[0, 0]).astype(o_ref.dtype)


def prepare_params(w1, b1, w2, b2):
    """One-time conversion to kernel layout (hoisted out of the forward call).

    w1: (D, 1024), b1: (1024,), w2: (1024, 1), b2: (1,)  (in,out layout).
    """
    w1_b = jnp.asarray(w1).astype(jnp.bfloat16)                        # (D, H) bf16 for MXU
    b1_row = jnp.asarray(b1).reshape(1, HIDDEN).astype(jnp.float32)    # (1, H) f32
    w2_row = jnp.asarray(w2).reshape(1, HIDDEN).astype(jnp.float32)    # (1, H) f32 (VPU path)
    b2_s = jnp.asarray(b2).reshape(1, 1).astype(jnp.float32)           # (1, 1) f32 -> SMEM
    return w1_b, b1_row, w2_row, b2_s


@functools.partial(jax.jit, static_argnames=("block_b",))
def discriminator_forward(x, w1_b, b1_row, w2_row, b2_s, *, block_b=None):
    """x: (B, D) float32 -> (B, 1) float32 sigmoid probabilities."""
    B, D = x.shape

    if block_b is None:
        # Auto tile: large tiles to amortize per-step pipeline overhead, but keep >= 2
        # grid steps when the batch allows so the "parallel" batch axis can be sharded
        # across v7x's 2 TensorCores (no-op on v5e/v6e, which have 1 TC/chip).
        if B <= 16:
            bb = _round_up(B, 8)                   # single tiny step, minimal padding waste
        elif B <= 2048:
            bb = _round_up(pl.cdiv(B, 2), 8)       # exactly 2 parallel steps
        else:
            bb = 1024                              # big tiles; x tile 128 KiB, h ~4 MiB f32
    else:
        bb = max(8, _round_up(int(block_b), 8))

    # Pad batch to a multiple of the tile (padded rows are computed and discarded).
    padded_B = _round_up(B, bb)
    if padded_B != B:
        x = jnp.pad(x, ((0, padded_B - B), (0, 0)))
    num_blocks = padded_B // bb

    # Constant-index operands are fetched once -> single-buffer them (saves a VMEM copy).
    resident = pl.Buffered(buffer_count=1)

    out = pl.pallas_call(
        _disc_kernel,
        out_shape=jax.ShapeDtypeStruct((padded_B, 1), jnp.float32),
        grid_spec=pltpu.PrefetchScalarGridSpec(
            num_scalar_prefetch=0,
            grid=(num_blocks,),
            in_specs=[
                pl.BlockSpec((bb, D), lambda i: (i, 0)),                 # x tile over batch
                pl.BlockSpec((D, HIDDEN), lambda i: (0, 0),
                             pipeline_mode=resident),                    # W1 (resident bf16)
                pl.BlockSpec((1, HIDDEN), lambda i: (0, 0),
                             pipeline_mode=resident),                    # b1 (f32)
                pl.BlockSpec((1, HIDDEN), lambda i: (0, 0),
                             pipeline_mode=resident),                    # w2 row (f32)
                pl.BlockSpec(memory_space=pltpu.MemorySpace.SMEM),       # b2 scalar
            ],
            out_specs=pl.BlockSpec((bb, 1), lambda i: (i, 0)),
        ),
        compiler_params=pltpu.CompilerParams(
            dimension_semantics=("parallel",),  # independent batch tiles -> megacore sharding
        ),
    )(x, w1_b, b1_row, w2_row, b2_s)

    return out[:B]


def init_params(key, D):
    """Deterministic xavier_normal-style init for the two Linear layers."""
    k1, k2 = jax.random.split(key)
    std1 = (2.0 / (D + HIDDEN)) ** 0.5
    std2 = (2.0 / (HIDDEN + 1)) ** 0.5
    w1 = jax.random.normal(k1, (D, HIDDEN), jnp.float32) * std1
    b1 = jnp.zeros((HIDDEN,), jnp.float32)
    w2 = jax.random.normal(k2, (HIDDEN, 1), jnp.float32) * std2
    b2 = jnp.zeros((1,), jnp.float32)
    return w1, b1, w2, b2


if __name__ == "__main__":
    key = jax.random.PRNGKey(0)
    kx, kp, kx2 = jax.random.split(key, 3)

    B, D = 8, 32  # batch=8, embedding_size=32
    x = jax.random.normal(kx, (B, D), jnp.float32)
    w1, b1, w2, b2 = init_params(kp, D)
    params = prepare_params(w1, b1, w2, b2)  # hoisted weight preprocessing

    def ref_fn(xx):
        return jax.nn.sigmoid(jnp.maximum(xx @ w1 + b1, 0.0) @ w2 + b2)

    # Small demo batch: single 8-row tile, one grid step.
    out = jax.block_until_ready(discriminator_forward(x, *params))
    assert out.shape == (B, 1)
    assert jnp.allclose(out, ref_fn(x), atol=2e-2, rtol=0.0)

    # Non-multiple batch: exercises padding and the 2-parallel-step path (v7x megacore).
    B2 = 50
    x2 = jax.random.normal(kx2, (B2, D), jnp.float32)
    out2 = jax.block_until_ready(discriminator_forward(x2, *params))
    assert out2.shape == (B2, 1)
    assert jnp.allclose(out2, ref_fn(x2), atol=2e-2, rtol=0.0)

    print("KERNEL_OK")
</pallas_src>

<mosaic_0001>
module attributes {stable_mosaic.version = 11 : i64} {
  func.func @_disc_kernel(%arg0: i32, %arg1: memref<8x32xf32, #tpu.memory_space<vmem>>, %arg2: memref<32x1024xbf16, #tpu.memory_space<vmem>>, %arg3: memref<1x1024xf32, #tpu.memory_space<vmem>>, %arg4: memref<1x1024xf32, #tpu.memory_space<vmem>>, %arg5: memref<1x1xf32, #tpu.memory_space<smem>>, %arg6: memref<8x1xf32, #tpu.memory_space<vmem>>) attributes {dimension_semantics = [#tpu.dimension_semantics<parallel>], iteration_bounds = array<i64: 1>, scalar_prefetch = 0 : i64, scratch_operands = 0 : i64, tpu.core_type = #tpu.core_type<tc>, window_params = [{transform_indices = @transform_0, window_bounds = array<i64: 8, 32>}, {pipeline_mode = #tpu.pipeline_mode<synchronous>, transform_indices = @transform_1, window_bounds = array<i64: 32, 1024>}, {pipeline_mode = #tpu.pipeline_mode<synchronous>, transform_indices = @transform_2, window_bounds = array<i64: 1, 1024>}, {pipeline_mode = #tpu.pipeline_mode<synchronous>, transform_indices = @transform_3, window_bounds = array<i64: 1, 1024>}, {transform_indices = @transform_4, window_bounds = array<i64: 1, 1>}, {transform_indices = @transform_5, window_bounds = array<i64: 8, 1>}]} {
    %c0 = arith.constant 0 : index
    %c0_0 = arith.constant 0 : index
    %0 = vector.load %arg1[%c0, %c0_0] : memref<8x32xf32, #tpu.memory_space<vmem>>, vector<8x32xf32>
    %1 = arith.truncf %0 : vector<8x32xf32> to vector<8x32xbf16>
    %c0_1 = arith.constant 0 : index
    %c0_2 = arith.constant 0 : index
    %2 = vector.load %arg2[%c0_1, %c0_2] : memref<32x1024xbf16, #tpu.memory_space<vmem>>, vector<32x1024xbf16>
    %cst = arith.constant dense<0.000000e+00> : vector<8x1024xf32>
    %3 = tpu.matmul %1, %2, %cst {dimension_numbers = #tpu.dot_dimension_numbers<[1], [0], [0], [1], [0, 0, 1, 1], [], []>} : vector<8x32xbf16>, vector<32x1024xbf16>, vector<8x1024xf32> -> vector<8x1024xf32>
    %c0_3 = arith.constant 0 : index
    %c0_4 = arith.constant 0 : index
    %4 = vector.load %arg3[%c0_3, %c0_4] : memref<1x1024xf32, #tpu.memory_space<vmem>>, vector<1x1024xf32>
    %5 = vector.broadcast %4 : vector<1x1024xf32> to vector<8x1024xf32>
    %6 = arith.addf %3, %5 : vector<8x1024xf32>
    %cst_5 = arith.constant 0.000000e+00 : f32
    %7 = vector.broadcast %cst_5 : f32 to vector<8x1024xf32>
    %8 = arith.maximumf %6, %7 : vector<8x1024xf32>
    %c0_6 = arith.constant 0 : index
    %c0_7 = arith.constant 0 : index
    %9 = vector.load %arg4[%c0_6, %c0_7] : memref<1x1024xf32, #tpu.memory_space<vmem>>, vector<1x1024xf32>
    %10 = vector.broadcast %9 : vector<1x1024xf32> to vector<8x1024xf32>
    %11 = arith.mulf %8, %10 : vector<8x1024xf32>
    %cst_8 = arith.constant dense<0.000000e+00> : vector<8xf32>
    %12 = vector.multi_reduction <add>, %11, %cst_8 [1] : vector<8x1024xf32> to vector<8xf32>
    %13 = vector.shape_cast %12 : vector<8xf32> to vector<8x1xf32>
    %c0_9 = arith.constant 0 : index
    %c0_10 = arith.constant 0 : index
    %14 = memref.load %arg5[%c0_9, %c0_10] : memref<1x1xf32, #tpu.memory_space<smem>>
    %15 = vector.broadcast %14 : f32 to vector<8x1xf32>
    %16 = arith.addf %13, %15 : vector<8x1xf32>
    %17 = arith.negf %16 : vector<8x1xf32>
    %18 = math.exp %17 : vector<8x1xf32>
    %cst_11 = arith.constant 1.000000e+00 : f32
    %19 = vector.broadcast %cst_11 : f32 to vector<8x1xf32>
    %20 = arith.addf %19, %18 : vector<8x1xf32>
    %21 = arith.divf %19, %20 : vector<8x1xf32>
    %c0_12 = arith.constant 0 : index
    %c0_13 = arith.constant 0 : index
    %22 = vector.load %arg6[%c0_12, %c0_13] : memref<8x1xf32, #tpu.memory_space<vmem>>, vector<8x1xf32>
    tpu.vector_store %arg6[%c0_12, %c0_13], %21 {strides = array<i32>} : memref<8x1xf32, #tpu.memory_space<vmem>>, vector<8x1xf32>,
    return
  }
  func.func @transform_0(%arg0: i32) -> (i32, i32) {
    %c0_i32 = arith.constant 0 : i32
    %c0_i32_0 = arith.constant 0 : i32
    return %arg0, %c0_i32 : i32, i32
  }
  func.func @transform_1(%arg0: i32) -> (i32, i32) {
    %c0_i32 = arith.constant 0 : i32
    %c0_i32_0 = arith.constant 0 : i32
    %c0_i32_1 = arith.constant 0 : i32
    return %c0_i32, %c0_i32_0 : i32, i32
  }
  func.func @transform_2(%arg0: i32) -> (i32, i32) {
    %c0_i32 = arith.constant 0 : i32
    %c0_i32_0 = arith.constant 0 : i32
    %c0_i32_1 = arith.constant 0 : i32
    return %c0_i32, %c0_i32_0 : i32, i32
  }
  func.func @transform_3(%arg0: i32) -> (i32, i32) {
    %c0_i32 = arith.constant 0 : i32
    %c0_i32_0 = arith.constant 0 : i32
    %c0_i32_1 = arith.constant 0 : i32
    return %c0_i32, %c0_i32_0 : i32, i32
  }
  func.func @transform_4(%arg0: i32) -> (i32, i32) {
    %c0_i32 = arith.constant 0 : i32
    %c0_i32_0 = arith.constant 0 : i32
    %c0_i32_1 = arith.constant 0 : i32
    return %c0_i32, %c0_i32_0 : i32, i32
  }
  func.func @transform_5(%arg0: i32) -> (i32, i32) {
    %c0_i32 = arith.constant 0 : i32
    %c0_i32_0 = arith.constant 0 : i32
    return %arg0, %c0_i32 : i32, i32
  }
}

</mosaic_0001>

<bundles_post_ra>
// kernel: discriminator_forward.1
= control target key start
LH: loop header
LB: loop body
LE: loop exit
PB: predicated region body
PF: predicated region fallthrough
CT: control target
= control target key end

     0   :  { %11 = vsyncpa [#allocation4], 0  ;;  %s647_s0 = inlined_call_operand.hbm [shape: f32[8,32], index: 0, kind: input, shape index: {}]   ;;  %s648_s1 = inlined_call_operand.hbm [shape: bf16[32,1024], index: 1, kind: input, shape index: {}]   ;;  %s649_s2 = inlined_call_operand.vmem [shape: f32[1,1024], index: 2, kind: input, shape index: {}]   ;;  %s650_s3 = inlined_call_operand.hbm [shape: f32[1,1024], index: 3, kind: input, shape index: {}]   ;;  %s651_s4 = inlined_call_operand.<no memory space> [shape: f32[1,1], index: 4, kind: input, shape index: {}]   ;;  %s652_s5 = inlined_call_operand.vmem [shape: f32[8,1], index: 5, kind: output, shape index: {}]  }
   0x1   :  { %12 = vsyncpa [#allocation6], 0  ;;  %s552_s18 = smov [#allocation5]   ;;  %s482_s22 = scalar_lea.hbm %s648_s1, 2048 }
   0x2   :  { %s28_s19 = sshll.u32 %s552_s18, 4  ;;  %p483_p0 = scmp.ne.s32.totalorder %s648_s1, %s482_s22  ;;  %s29_s19 = int_to_ptr.vmem [resolvable:$true] %s28_s19 }
   0x3   :  { %p486_p1 = scmp.lt.u32.totalorder %s482_s22, %s648_s1 }
   0x5   :  { %p488_p2 = pnand %p486_p1, %p483_p0 }
   0x7   :  { %491 = shalt.err (!%p488_p2)
}
   0x8   :  { %s492_s27 = scalar_lea.vmem %s29_s19, 2048  ;;  %p497_p4 = scmp.lt.s32.totalorder %s29_s19, %s29_s19 }
   0x9   :  { %p493_p3 = scmp.ne.s32.totalorder %s29_s19, %s492_s27  ;;  %p498_p5 = scmp.lt.s32.totalorder %s492_s27, %s492_s27 }
   0xb   :  { %p499_p6 = por %p498_p5, %p497_p4 }
   0xd   :  { %p500_p7 = pnand %p499_p6, %p493_p3 }
   0xf   :  { %503 = shalt.err (!%p500_p7)
}
  0x10   :  { %s553_s28 = smov 512   ;;  %s554_s29 = smov 32  }
  0x11   :  { %34 = dma.hbm_to_vmem [thread:$0]  %s648_s1, 2048, %s29_s19, [#allocation6], %s553_s28, %s553_s28, %s554_s29  }
  0x12   :  { %s555_s7 = smov [#allocation3]   ;;  %s556_s9 = smov [#allocation7]  }
  0x13   :  { %s19_s8 = sshll.u32 %s555_s7, 4  ;;  %s43_s10 = sshll.u32 %s556_s9, 4  ;;  %s20_s8 = int_to_ptr.vmem [resolvable:$true] %s19_s8  ;;  %s44_s10 = int_to_ptr.vmem [resolvable:$true] %s43_s10 }
  0x14   :  { %s504_s13 = scalar_lea.hbm %s647_s0, 128 }
  0x15   :  { %p505_p8 = scmp.ne.s32.totalorder %s647_s0, %s504_s13  ;;  %p508_p9 = scmp.lt.u32.totalorder %s504_s13, %s647_s0 }
  0x17   :  { %p510_p10 = pnand %p508_p9, %p505_p8 }
  0x19   :  { %513 = shalt.err (!%p510_p10)
}
  0x1a   :  { %s514_s1 = scalar_lea.vmem %s20_s8, 128  ;;  %p519_p12 = scmp.lt.s32.totalorder %s20_s8, %s20_s8 }
  0x1b   :  { %p515_p11 = scmp.ne.s32.totalorder %s20_s8, %s514_s1  ;;  %p520_p13 = scmp.lt.s32.totalorder %s514_s1, %s514_s1 }
  0x1d   :  { %p521_p0 = por %p520_p13, %p519_p12 }
  0x1f   :  { %p522_p1 = pnand %p521_p0, %p515_p11 }
  0x21   :  { %525 = shalt.err (!%p522_p1)
}
  0x22   :  { %22 = dma.hbm_to_vmem [thread:$0]  %s647_s0, 128, %s20_s8, [#allocation4]  }
  0x23   :  { %s526_s22 = scalar_lea.hbm %s650_s3, 128 }
  0x24   :  { %p527_p2 = scmp.ne.s32.totalorder %s650_s3, %s526_s22  ;;  %p530_p3 = scmp.lt.u32.totalorder %s526_s22, %s650_s3 }
  0x26   :  { %p532_p4 = pnand %p530_p3, %p527_p2 }
  0x28   :  { %535 = shalt.err (!%p532_p4)
}
  0x29   :  { %s536_s27 = scalar_lea.vmem %s44_s10, 128  ;;  %p541_p6 = scmp.lt.s32.totalorder %s44_s10, %s44_s10 }
  0x2a   :  { %p537_p5 = scmp.ne.s32.totalorder %s44_s10, %s536_s27  ;;  %p542_p7 = scmp.lt.s32.totalorder %s536_s27, %s536_s27 }
  0x2c   :  { %p543_p8 = por %p542_p7, %p541_p6 }
  0x2e   :  { %p544_p9 = pnand %p543_p8, %p537_p5 }
  0x30   :  { %547 = shalt.err (!%p544_p9)
}
  0x31   :  { %46 = dma.hbm_to_vmem [thread:$0]  %s650_s3, 128, %s44_s10, [#allocation6]  }
  0x32   :  { %548 = dma.done.wait [#allocation4], 128  }
  0x33   :  { %549 = vsyncadd [#allocation4], 4294967168 }
  0x34   :  { %550 = dma.done.wait [#allocation6], 2176  }
  0x35   :  { %551 = vsyncadd [#allocation6], 4294965120  ;;  %v557_v0 = vmov 0   ;;  %v61_v1 = vld [vmem:[#allocation5] sm:$0xff]  ;;  %v62_v3 = vld [vmem:[#allocation5 + $0x8] sm:$0xff]  ;;  %vm199_vm0 = vcmask 261120   ;;  %v79_v35 = vlaneseq }
  0x36   :  { %235 = vmatprep.mubr.bf16.mxu0 %v557_v0  ;;  %276 = vmatprep.mubr.bf16.mxu1 %v557_v0  ;;  %v65_v2 = vld [vmem:[#allocation5 + $0x20] sm:$0xff]  ;;  %v66_v6 = vld [vmem:[#allocation5 + $0x28] sm:$0xff]  ;;  %v63_v15 = vld [vmem:[#allocation5 + $0x10] sm:$0xff]  ;;  %vm443_vm1 = vcmask 7168  }
  0x37   :  { %v452_v4 = vcombine.high %v61_v1, %v65_v2  ;;  %v451_v5 = vcombine.low %v61_v1, %v65_v2  ;;  %v69_v7 = vld [vmem:[#allocation5 + $0x40] sm:$0xff]  ;;  %v454_v9 = vcombine.high %v62_v3, %v66_v6  ;;  %v453_v10 = vcombine.low %v62_v3, %v66_v6  ;;  %v70_v12 = vld [vmem:[#allocation5 + $0x48] sm:$0xff]  ;;  %v67_v16 = vld [vmem:[#allocation5 + $0x30] sm:$0xff] }
  0x38   :  { %v73_v8 = vld [vmem:[#allocation5 + $0x60] sm:$0xff]  ;;  %v74_v13 = vld [vmem:[#allocation5 + $0x68] sm:$0xff]  ;;  %v64_v17 = vld [vmem:[#allocation5 + $0x18] sm:$0xff]  ;;  %v456_v22 = vcombine.high %v63_v15, %v67_v16  ;;  %v455_v29 = vcombine.low %v63_v15, %v67_v16  ;;  %v628_v36 = vshrl.u32 %v79_v35, 7 }
  0x39   :  { %v460_v11 = vcombine.high %v69_v7, %v73_v8  ;;  %203 = vmatprep.subr.bf16.mxu0 %v452_v4  ;;  %v462_v14 = vcombine.high %v70_v12, %v74_v13  ;;  %244 = vmatprep.subr.bf16.mxu1 %v454_v9  ;;  %v459_v18 = vcombine.low %v69_v7, %v73_v8  ;;  %v59_v19 = vld [vmem:[#allocation3] sm:$0xff]  ;;  %v71_v24 = vld [vmem:[#allocation5 + $0x50] sm:$0xff]  ;;  %v375_v43 = vld [vmem:[#allocation7] sm:$0xff] }
  0x3a   :  { %204 = vmatpush1.bf16.msra.mxu0 %v451_v5  ;;  %v68_v20 = vld [vmem:[#allocation5 + $0x38] sm:$0xff]  ;;  %245 = vmatpush1.bf16.msra.mxu1 %v453_v10  ;;  %v461_v21 = vcombine.low %v70_v12, %v74_v13  ;;  %v75_v25 = vld [vmem:[#allocation5 + $0x70] sm:$0xff]  ;;  %v60_v26 = vpack.c.bf16 %v59_v19, %v59_v19  ;;  %v81_v37 = vsub.s32 0, %v628_v36  ;;  %v85_v39 = vsub.s32 1, %v628_v36 }
  0x3b   :  { %205 = vmatprep.subr.bf16.mxu0 %v460_v11  ;;  %246 = vmatprep.subr.bf16.mxu1 %v462_v14  ;;  %v458_v23 = vcombine.high %v64_v17, %v68_v20  ;;  %v72_v27 = vld [vmem:[#allocation5 + $0x58] sm:$0xff]  ;;  %v457_v30 = vcombine.low %v64_v17, %v68_v20  ;;  %v464_v31 = vcombine.high %v71_v24, %v75_v25  ;;  %v89_v40 = vsub.s32 2, %v628_v36 }
  0x3c   :  { %v76_v28 = vld [vmem:[#allocation5 + $0x78] sm:$0xff]  ;;  %v463_v33 = vcombine.low %v71_v24, %v75_v25  ;;  %v93_v41 = vsub.s32 3, %v628_v36  ;;  %v380_v48 = vrot.slane %v375_v43, %v81_v37  ;;  %v384_v51 = vrot.slane %v375_v43, %v85_v39 }
  0x3d   :  { %v466_v32 = vcombine.high %v72_v27, %v76_v28  ;;  %v465_v34 = vcombine.low %v72_v27, %v76_v28  ;;  %v77_v38 = vld [vmem:[%s649_s2] sm:$0xff]  ;;  %v388_v53 = vrot.slane %v375_v43, %v89_v40  ;;  %v97_v54 = vsub.s32 4, %v628_v36 }
  0x3e   :  { %206 = vmatpush1.bf16.msra.mxu0 %v459_v18  ;;  %247 = vmatpush1.bf16.msra.mxu1 %v461_v21  ;;  %v82_v42 = vrot.slane %v77_v38, %v81_v37  ;;  %v86_v44 = vrot.slane %v77_v38, %v85_v39  ;;  %v90_v45 = vrot.slane %v77_v38, %v89_v40  ;;  %v101_v59 = vsub.s32 5, %v628_v36 }
  0x3f   :  { %285 = vmatprep.subr.bf16.mxu0 %v456_v22  ;;  %326 = vmatprep.subr.bf16.mxu1 %v458_v23  ;;  %v94_v46 = vrot.slane %v77_v38, %v93_v41  ;;  %v105_v60 = vsub.s32 6, %v628_v36  ;;  %v109_v1 = vsub.s32 7, %v628_v36  ;;  %v392_v4 = vrot.slane %v375_v43, %v93_v41 }
  0x40   :  { %v98_v8 = vrot.slane %v77_v38, %v97_v54  ;;  %v102_v11 = vrot.slane %v77_v38, %v101_v59  ;;  %v396_v18 = vrot.slane %v375_v43, %v97_v54  ;;  %v400_v23 = vrot.slane %v375_v43, %v101_v59 }
  0x41   :  { %467 = vmatmul.mubr.msk.bf16.vlgmr.msra.gmra.mrb[0].mxu0 %vm199_vm0, %v60_v26  ;;  %468 = vmatmul.mubr.msk.bf16.vlgmr.msra.gmra.mrb[0].mxu1 %vm199_vm0, %v60_v26  ;;  %v106_v12 = vrot.slane %v77_v38, %v105_v60  ;;  %v110_v13 = vrot.slane %v77_v38, %v109_v1  ;;  %v404_v28 = vrot.slane %v375_v43, %v105_v60 }
  0x42   :  { %286 = vmatpush1.bf16.msra.mxu0 %v455_v29  ;;  %327 = vmatpush1.bf16.msra.mxu1 %v457_v30  ;;  %v408_v41 = vrot.slane %v375_v43, %v109_v1 }
  0x43   :  { %287 = vmatprep.subr.bf16.mxu0 %v464_v31  ;;  %328 = vmatprep.subr.bf16.mxu1 %v466_v32 }
  0x44   :  { %317 = vmatprep.mubr.bf16.mxu0 %v557_v0  ;;  %358 = vmatprep.mubr.bf16.mxu1 %v557_v0 }
  0x46   :  { %288 = vmatpush1.bf16.msra.mxu0 %v463_v33  ;;  %329 = vmatpush1.bf16.msra.mxu1 %v465_v34 }
  0x49   :  { %469 = vmatmul.mubr.msk.bf16.vlgmr.msra.gmra.mrb[4].mxu0 %vm199_vm0, %v60_v26  ;;  %470 = vmatmul.mubr.msk.bf16.vlgmr.msra.gmra.mrb[4].mxu1 %vm199_vm0, %v60_v26 }
 0x114   :  { %v237_v47 = vpop.f32.mrb[0].mxu0  ;;  %v278_v52 = vpop.f32.mrb[0].mxu1 }
 0x115   :  { %v238_v49 = vadd.f32 %v237_v47, %v82_v42  ;;  %v239_v50 = vpop.f32.mrb[1].mxu0  ;;  %v279_v57 = vadd.f32 %v278_v52, %v90_v45  ;;  %v280_v58 = vpop.f32.mrb[1].mxu1  ;;  %v435_v47 = vstv %s651_s4 }
 0x116   :  { %v240_v55 = vadd.f32 %v239_v50, %v86_v44  ;;  %v241_v56 = vpop.f32.mrb[2].mxu0  ;;  %v281_v63 = vadd.f32 %v280_v58, %v94_v46  ;;  %v282_v0 = vpop.f32.mrb[2].mxu1 }
 0x117   :  { %v367_v61 = vmax.f32 %v238_v49, 0.0  ;;  %v242_v62 = vpop.f32.mrb[3].mxu0  ;;  %v369_v3 = vmax.f32 %v279_v57, 0.0  ;;  %v283_v5 = vpop.f32.mrb[3].mxu1 }
 0x118   :  { %v368_v2 = vmax.f32 %v240_v55, 0.0  ;;  %v370_v7 = vmax.f32 %v281_v63, 0.0 }
 0x119   :  { %v417_v6 = vmul.f32 %v380_v48, %v367_v61  ;;  %v419_v10 = vmul.f32 %v388_v53, %v369_v3 }
 0x11a   :  { %v418_v9 = vmul.f32 %v384_v51, %v368_v2  ;;  %v420_v15 = vmul.f32 %v392_v4, %v370_v7 }
 0x11c   :  { %v425_v14 = vadd.f32 %v418_v9, %v417_v6  ;;  %v319_v16 = vpop.f32.mrb[4].mxu0  ;;  %v360_v20 = vpop.f32.mrb[4].mxu1 }
 0x11d   :  { %v320_v17 = vadd.f32 %v319_v16, %v98_v8  ;;  %v321_v19 = vpop.f32.mrb[5].mxu0  ;;  %v361_v25 = vadd.f32 %v360_v20, %v106_v12  ;;  %v362_v26 = vpop.f32.mrb[5].mxu1 }
 0x11e   :  { %v426_v21 = vadd.f32 %v425_v14, %v419_v10  ;;  %v322_v22 = vadd.f32 %v321_v19, %v102_v11  ;;  %v323_v24 = vpop.f32.mrb[6].mxu0  ;;  %v363_v30 = vadd.f32 %v362_v26, %v110_v13  ;;  %v364_v31 = vpop.f32.mrb[6].mxu1 }
 0x11f   :  { %v371_v27 = vmax.f32 %v320_v17, 0.0  ;;  %v324_v29 = vpop.f32.mrb[7].mxu0  ;;  %v373_v34 = vmax.f32 %v361_v25, 0.0  ;;  %v365_v35 = vpop.f32.mrb[7].mxu1 }
 0x120   :  { %v427_v32 = vadd.f32 %v426_v21, %v420_v15  ;;  %v372_v33 = vmax.f32 %v322_v22, 0.0  ;;  %v374_v40 = vmax.f32 %v363_v30, 0.0 }
 0x121   :  { %v421_v36 = vmul.f32 %v396_v18, %v371_v27  ;;  %v423_v39 = vmul.f32 %v404_v28, %v373_v34 }
 0x122   :  { %v422_v37 = vmul.f32 %v400_v23, %v372_v33  ;;  %v424_v44 = vmul.f32 %v408_v41, %v374_v40 }
 0x123   :  { %v428_v38 = vadd.f32 %v427_v32, %v421_v36 }
 0x125   :  { %v429_v42 = vadd.f32 %v428_v38, %v422_v37 }
 0x127   :  { %v430_v45 = vadd.f32 %v429_v42, %v423_v39 }
 0x129   :  { %v431_v46 = vadd.f32 %v430_v45, %v424_v44 }
 0x12b   :  { %432 = vadd.xlane.f32.xlu0 %v431_v46 }
 0x1b8   :  { %v433_v48 = vpop.xlane.xlu0 %432 }
 0x1b9   :  { %v436_v49 = vadd.f32 %v435_v47, %v433_v48 }
 0x1bb   :  { %v471_v50 = vmul.f32 -1.442695, %v436_v49 }
 0x1bd   :  { %478 = vpow2.f32 %v471_v50 }
 0x1c7   :  { %v479_v51 = vpop.eup %478 }
 0x1c8   :  { %v440_v52 = vadd.f32 1.0, %v479_v51 }
 0x1ca   :  { %480 = vrcp.f32 %v440_v52 }
 0x1d4   :  { %v481_v53 = vpop.eup %480 }
 0x1d5   :  { %444 = vst.msk [vmem:[%s652_s5] sm:$0xff] %vm443_vm1, %v481_v53 }
 0x1d6   :  { %449 = vsyncpa [#allocation4], 1 }
 0x1d7   :  { %450 = vsyncpa [#allocation6], 1 }

</bundles_post_ra>
